<compile_context>
chip_gen: v7x
topology: tpu7x:2x2x1
jax: 0.10.0
libtpu: 0.0.40
codegen_flags: <defaults>
</compile_context>

<pallas_src>
import jax
import jax.numpy as jnp
from jax import lax
from jax.experimental import pallas as pl
from jax.experimental.pallas import tpu as pltpu

VMEM_LIMIT = 48 * 1024 * 1024    # ok on v5e/v6e (128 MiB) and within v7x's 64 MiB
BLOCK_BUDGET = 16 * 1024 * 1024  # budget for double-buffered streaming blocks


def _round_up(x, m):
    return ((x + m - 1) // m) * m


def _budget_divisor(n, per_unit_bytes, budget_bytes, align=1):
    """Largest divisor d of n with d*per_unit_bytes <= budget (and d % align == 0
    or d == n). Falls back to n (full block) if no aligned divisor exists."""
    limit = max(1, budget_bytes // max(per_unit_bytes, 1))
    best = None
    for d in range(1, n + 1):
        if n % d == 0 and d <= limit and (d % align == 0 or d == n):
            best = d
    return best if best is not None else n


def _pad_gates(w, H, Hp):
    """Pad each of the 3 GRU gate segments along axis 0 from H to Hp with zeros."""
    if Hp == H:
        return w
    pad = [(0, Hp - H)] + [(0, 0)] * (w.ndim - 1)
    return jnp.concatenate(
        [jnp.pad(w[g * H:(g + 1) * H], pad) for g in range(3)], axis=0)


# ----------------------------- linear (tiled) -------------------------------

def _linear_kernel(x_ref, w_ref, b_ref, o_ref):
    # x, w are already bf16 (pre-cast in the wrapper); accumulate in f32.
    o_ref[...] = (jnp.dot(x_ref[...], w_ref[...],
                          preferred_element_type=jnp.float32)
                  + b_ref[...]).astype(o_ref.dtype)


def linear(x, w, b, *, block_m=512, out_dtype=jnp.float32):
    """x:(M,K) @ w:(K,N) + b:(N,) -> (M,N) in out_dtype.

    Tiled over M ("parallel"); N padded to a 128-lane multiple so stores are
    lane-dense (padding sliced off outside). Operands fed to the MXU in bf16.
    """
    M, K = x.shape
    N = w.shape[1]
    bm = min(block_m, _round_up(M, 8))
    Mp = _round_up(M, bm)
    Np = _round_up(N, 128)
    x = x.astype(jnp.bfloat16)
    if Mp != M:
        x = jnp.pad(x, ((0, Mp - M), (0, 0)))
    wp = w.astype(jnp.bfloat16)
    bp = b
    if Np != N:
        wp = jnp.pad(wp, ((0, 0), (0, Np - N)))
        bp = jnp.pad(bp, (0, Np - N))
    out = pl.pallas_call(
        _linear_kernel,
        out_shape=jax.ShapeDtypeStruct((Mp, Np), out_dtype),
        grid=(Mp // bm,),
        in_specs=[pl.BlockSpec((bm, K), lambda i: (i, 0)),
                  pl.BlockSpec((K, Np), lambda i: (0, 0)),
                  pl.BlockSpec((1, Np), lambda i: (0, 0))],
        out_specs=pl.BlockSpec((bm, Np), lambda i: (i, 0)),
        compiler_params=pltpu.CompilerParams(
            dimension_semantics=("parallel",),
            vmem_limit_bytes=VMEM_LIMIT),
    )(x, wp, bp.reshape(1, Np))
    return out[:M, :N]


# ---------------------- fused layernorm + linear (tiled) --------------------

def _ln_linear_kernel(x_ref, g_ref, b_ref, w_ref, bias_ref, o_ref):
    x = x_ref[...].astype(jnp.float32)
    mean = jnp.mean(x, axis=-1, keepdims=True)
    var = jnp.mean(jnp.square(x - mean), axis=-1, keepdims=True)
    xn = (x - mean) * lax.rsqrt(var + 1e-5) * g_ref[...] + b_ref[...]
    o_ref[...] = (jnp.dot(xn.astype(jnp.bfloat16), w_ref[...],
                          preferred_element_type=jnp.float32)
                  + bias_ref[...]).astype(o_ref.dtype)


def layernorm_linear(x, gamma, beta, w, b, *, block_r=512, out_dtype=jnp.float32):
    """LayerNorm(x) @ w + b as one row-tiled kernel (gen_out makes one HBM pass)."""
    R, H = x.shape
    N = w.shape[1]
    br = min(block_r, _round_up(R, 8))
    Rp = _round_up(R, br)
    Np = _round_up(N, 128)
    x = x.astype(jnp.bfloat16)
    if Rp != R:
        x = jnp.pad(x, ((0, Rp - R), (0, 0)))
    wp = w.astype(jnp.bfloat16)
    bp = b
    if Np != N:
        wp = jnp.pad(wp, ((0, 0), (0, Np - N)))
        bp = jnp.pad(bp, (0, Np - N))
    out = pl.pallas_call(
        _ln_linear_kernel,
        out_shape=jax.ShapeDtypeStruct((Rp, Np), out_dtype),
        grid=(Rp // br,),
        in_specs=[pl.BlockSpec((br, H), lambda i: (i, 0)),
                  pl.BlockSpec((1, H), lambda i: (0, 0)),
                  pl.BlockSpec((1, H), lambda i: (0, 0)),
                  pl.BlockSpec((H, Np), lambda i: (0, 0)),
                  pl.BlockSpec((1, Np), lambda i: (0, 0))],
        out_specs=pl.BlockSpec((br, Np), lambda i: (i, 0)),
        compiler_params=pltpu.CompilerParams(
            dimension_semantics=("parallel",),
            vmem_limit_bytes=VMEM_LIMIT),
    )(x, gamma.reshape(1, H), beta.reshape(1, H), wp, bp.reshape(1, Np))
    return out[:R, :N]


# -------------------- masked max over sequence (chunked) --------------------

def _masked_max_kernel(x_ref, m_ref, o_ref):
    @pl.when(pl.program_id(1) == 0)
    def _():
        o_ref[...] = jnp.full_like(o_ref, -1e6)   # sentinel matches original
    x = x_ref[...].astype(jnp.float32)            # (bb, tc, H)
    m = m_ref[...]                                # (bb, tc, 1)
    xm = jnp.where(m > 0.0, x, -jnp.inf)          # exclude masked (no multiply)
    o_ref[...] = jnp.maximum(o_ref[...], jnp.max(xm, axis=1))


def masked_max(x, masks_, *, block_budget=BLOCK_BUDGET):
    """x:(B,S,H), masks_:(B,S,1) -> (B,H) f32. Parallel over B-blocks,
    arbitrary over sequence chunks with an output-resident running max."""
    B, S, H = x.shape
    bb = 8 if (B % 8 == 0 and B > 8) else B
    nb = B // bb
    per_t = 2 * bb * (H * x.dtype.itemsize + 4)   # double-buffered x + mask rows
    tc = _budget_divisor(S, per_t, block_budget, align=8)
    nc = S // tc
    return pl.pallas_call(
        _masked_max_kernel,
        out_shape=jax.ShapeDtypeStruct((B, H), jnp.float32),
        grid=(nb, nc),
        in_specs=[pl.BlockSpec((bb, tc, H), lambda bi, si: (bi, si, 0)),
                  pl.BlockSpec((bb, tc, 1), lambda bi, si: (bi, si, 0))],
        out_specs=pl.BlockSpec((bb, H), lambda bi, si: (bi, 0)),
        compiler_params=pltpu.CompilerParams(
            dimension_semantics=("parallel", "arbitrary"),
            vmem_limit_bytes=VMEM_LIMIT),
    )(x, masks_)


# ---------------- bidirectional GRU recurrence (time-chunked) ---------------

def _bigru_recurrence_kernel(xgf_ref, xgb_ref, wf_ref, wb_ref, bf_ref, bb_ref,
                             of_ref, ob_ref, hf_ref, hb_ref):
    tc = xgf_ref.shape[0]
    Hp = hf_ref.shape[-1]

    @pl.when(pl.program_id(0) == 0)
    def _():
        hf_ref[...] = jnp.zeros_like(hf_ref)
        hb_ref[...] = jnp.zeros_like(hb_ref)

    wf = wf_ref[...]      # (Hp, 3Hp) bf16, loop-invariant
    wb = wb_ref[...]
    bf = bf_ref[...]      # (1, 3Hp) f32
    bb = bb_ref[...]

    def cell(xg, gh, h_prev):
        # PyTorch GRU gate order (r, z, n); r gates the hidden contribution.
        # All slices are Hp-aligned (128-lane multiples) -> no lane shuffles.
        r = jax.nn.sigmoid(xg[:, :Hp] + gh[:, :Hp])
        z = jax.nn.sigmoid(xg[:, Hp:2 * Hp] + gh[:, Hp:2 * Hp])
        n = jnp.tanh(xg[:, 2 * Hp:] + r * gh[:, 2 * Hp:])
        return (1.0 - z) * n + z * h_prev

    def step(t, carry):
        hf, hb = carry
        # One (Bp,Hp)x(Hp,3Hp) dot per direction (no zero block-diag work).
        ghf = jnp.dot(hf.astype(jnp.bfloat16), wf,
                      preferred_element_type=jnp.float32) + bf
        ghb = jnp.dot(hb.astype(jnp.bfloat16), wb,
                      preferred_element_type=jnp.float32) + bb
        xf = xgf_ref[t].astype(jnp.float32)
        xb = xgb_ref[tc - 1 - t].astype(jnp.float32)
        hf_new = cell(xf, ghf, hf)
        hb_new = cell(xb, ghb, hb)
        of_ref[t] = hf_new.astype(of_ref.dtype)
        ob_ref[tc - 1 - t] = hb_new.astype(ob_ref.dtype)
        return (hf_new, hb_new)

    hf_fin, hb_fin = lax.fori_loop(0, tc, step, (hf_ref[...], hb_ref[...]),
                                   unroll=2)
    hf_ref[...] = hf_fin
    hb_ref[...] = hb_fin


def bigru_recurrence(xg_f, xg_b, w_hh_f, b_hh_f, w_hh_b, b_hh_b, H, Hp,
                     *, block_budget=BLOCK_BUDGET):
    """xg_f/xg_b: (S, Bp, 3Hp) bf16 input-gate projections per direction in
    forward-time order (gates padded to Hp lanes). Returns (hf, hb), each
    (S, Bp, Hp) bf16 in forward-time order."""
    S, Bp, threeHp = xg_f.shape

    def hidden_weight(w_hh):                      # (3H, H) -> (Hp, 3Hp) bf16
        w = _pad_gates(w_hh, H, Hp)               # (3Hp, H), per-gate padding
        w = jnp.pad(w, ((0, 0), (0, Hp - H)))     # pad input H -> Hp
        return w.T.astype(jnp.bfloat16)

    wf = hidden_weight(w_hh_f)
    wb = hidden_weight(w_hh_b)
    bf = _pad_gates(b_hh_f, H, Hp).reshape(1, 3 * Hp)
    bb = _pad_gates(b_hh_b, H, Hp).reshape(1, 3 * Hp)

    # VMEM-budgeted time chunk (double-buffered bf16 inputs + outputs).
    per_t = 2 * (2 * Bp * 3 * Hp * 2 + 2 * Bp * Hp * 2)
    tc = _budget_divisor(S, per_t, block_budget)
    nc = S // tc

    cost = pl.CostEstimate(
        flops=2 * 2 * S * Bp * Hp * 3 * Hp + 12 * S * Bp * 2 * Hp,
        transcendentals=6 * S * Bp * Hp,
        bytes_accessed=2 * (2 * S * Bp * 3 * Hp + 2 * S * Bp * Hp)
                       + 2 * 2 * Hp * 3 * Hp + 4 * 2 * 3 * Hp)

    return pl.pallas_call(
        _bigru_recurrence_kernel,
        out_shape=(jax.ShapeDtypeStruct((S, Bp, Hp), jnp.bfloat16),
                   jax.ShapeDtypeStruct((S, Bp, Hp), jnp.bfloat16)),
        grid=(nc,),
        in_specs=[pl.BlockSpec((tc, Bp, 3 * Hp), lambda ci: (ci, 0, 0)),
                  pl.BlockSpec((tc, Bp, 3 * Hp), lambda ci: (nc - 1 - ci, 0, 0)),
                  pl.BlockSpec((Hp, 3 * Hp), lambda ci: (0, 0)),
                  pl.BlockSpec((Hp, 3 * Hp), lambda ci: (0, 0)),
                  pl.BlockSpec((1, 3 * Hp), lambda ci: (0, 0)),
                  pl.BlockSpec((1, 3 * Hp), lambda ci: (0, 0))],
        out_specs=(pl.BlockSpec((tc, Bp, Hp), lambda ci: (ci, 0, 0)),
                   pl.BlockSpec((tc, Bp, Hp), lambda ci: (nc - 1 - ci, 0, 0))),
        scratch_shapes=[pltpu.VMEM((Bp, Hp), jnp.float32),
                        pltpu.VMEM((Bp, Hp), jnp.float32)],
        compiler_params=pltpu.CompilerParams(
            dimension_semantics=("arbitrary",),
            vmem_limit_bytes=VMEM_LIMIT),
        cost_estimate=cost,
    )(xg_f, xg_b, wf, wb, bf, bb)


def bigru(x_bse, layers):
    """Bidirectional multi-layer GRU, batch_first semantics like nn.GRU.
    Returns the full output sequence (B, S, 2H) in bf16 (= SelectItem(0))."""
    x_tm = jnp.transpose(x_bse, (1, 0, 2))            # (S, B, I) time-major
    S, B, _ = x_tm.shape
    Bp = _round_up(B, 8)
    if Bp != B:                                        # pad batch ONCE
        x_tm = jnp.pad(x_tm, ((0, 0), (0, Bp - B), (0, 0)))
    for lp in layers:
        I = x_tm.shape[-1]
        H = lp["w_hh_f"].shape[1]
        Hp = _round_up(H, 128)                         # lane-aligned gate segments
        # Fused input projection for BOTH directions, per-gate lane padding:
        w_ih = jnp.concatenate(
            [_pad_gates(lp["w_ih_f"], H, Hp), _pad_gates(lp["w_ih_b"], H, Hp)],
            axis=0).T                                  # (I, 6Hp)
        b_ih = jnp.concatenate(
            [_pad_gates(lp["b_ih_f"], H, Hp), _pad_gates(lp["b_ih_b"], H, Hp)])
        xg = linear(x_tm.reshape(S * Bp, I), w_ih, b_ih,
                    out_dtype=jnp.bfloat16).reshape(S, Bp, 6 * Hp)
        hf, hb = bigru_recurrence(xg[..., :3 * Hp], xg[..., 3 * Hp:],
                                  lp["w_hh_f"], lp["b_hh_f"],
                                  lp["w_hh_b"], lp["b_hh_b"], H, Hp)
        x_tm = jnp.concatenate([hf[..., :H], hb[..., :H]], axis=-1)  # (S,Bp,2H) bf16
    return jnp.transpose(x_tm[:, :B], (1, 0, 2))       # (B, S, 2H) bf16


# ----------------------------- model forward --------------------------------

def forward(params, inputs, masks, key):
    """inputs: (B, S) int32 token ids, masks: (B, S) float32 -> (z, cls_logits)."""
    masks_ = masks[..., None]                                        # (B, S, 1)
    embedding = masks_ * jnp.take(params["emb"], inputs, axis=0)     # (B, S, E)

    # generator: gen GRU -> SelectItem(0) -> LayerNorm -> Dropout -> gen_fc
    gen_out = bigru(embedding, params["gen"])                        # (B,S,Hd) bf16
    # TODO(synk): dropout treated as identity (inference semantics; no RNG drop).
    B, S, Hd = gen_out.shape
    gen_logits = layernorm_linear(gen_out.reshape(B * S, Hd),
                                  params["ln_g"], params["ln_b"],
                                  params["gen_fc_w"], params["gen_fc_b"]
                                  ).reshape(B, S, -1)

    # straight-through gumbel-softmax (hard=True, tau=1): forward value is one-hot
    g = jax.random.gumbel(key, gen_logits.shape, dtype=gen_logits.dtype)
    y_soft = jax.nn.softmax(gen_logits + g, axis=-1)
    z = jax.nn.one_hot(jnp.argmax(y_soft, axis=-1), 2, dtype=gen_logits.dtype)

    cls_embedding = embedding * z[:, :, 1:2]                         # (B, S, E)
    cls_out = bigru(cls_embedding, params["cls"])                    # (B,S,Hd) bf16
    pooled = masked_max(cls_out, masks_)                             # (B, Hd) f32
    cls_logits = linear(pooled, params["cls_fc_w"], params["cls_fc_b"])
    return z, cls_logits


# --------------------------- deterministic params ---------------------------

def init_params(key, vocab, E, Hd, num_layers, num_class):
    Hh = Hd // 2
    keys = iter(jax.random.split(key, 256))

    def nrm(shape, scale=0.1):
        return scale * jax.random.normal(next(keys), shape, dtype=jnp.float32)

    def gru_layers():
        layers = []
        for l in range(num_layers):
            I = E if l == 0 else Hd
            layers.append(dict(
                w_ih_f=nrm((3 * Hh, I)), b_ih_f=nrm((3 * Hh,)),
                w_hh_f=nrm((3 * Hh, Hh)), b_hh_f=nrm((3 * Hh,)),
                w_ih_b=nrm((3 * Hh, I)), b_ih_b=nrm((3 * Hh,)),
                w_hh_b=nrm((3 * Hh, Hh)), b_hh_b=nrm((3 * Hh,)),
            ))
        return layers

    return dict(
        emb=nrm((vocab, E), 1.0),
        gen=gru_layers(),
        cls=gru_layers(),
        gen_fc_w=nrm((Hd, 2)), gen_fc_b=nrm((2,)),
        cls_fc_w=nrm((Hd, num_class)), cls_fc_b=nrm((num_class,)),
        ln_g=jnp.ones((Hd,), jnp.float32), ln_b=jnp.zeros((Hd,), jnp.float32),
    )


if __name__ == "__main__":
    B, S = 2, 8
    vocab, E, Hd, num_layers, num_class = 32, 16, 32, 1, 2

    key = jax.random.PRNGKey(0)
    kp, ki, kg = jax.random.split(key, 3)
    params = init_params(kp, vocab, E, Hd, num_layers, num_class)

    inputs = jax.random.randint(ki, (B, S), 0, vocab, dtype=jnp.int32)
    lengths = jnp.array([S, S - 3], dtype=jnp.int32)
    masks = (jnp.arange(S)[None, :] < lengths[:, None]).astype(jnp.float32)

    z, cls_logits = forward(params, inputs, masks, kg)
    jax.block_until_ready((z, cls_logits))

    assert z.shape == (B, S, 2)
    assert cls_logits.shape == (B, num_class)
    print("KERNEL_OK")
</pallas_src>

<mosaic_0001>
module attributes {stable_mosaic.version = 11 : i64} {
  func.func @_linear_kernel(%arg0: i32, %arg1: memref<64x16xbf16, #tpu.memory_space<vmem>>, %arg2: memref<16x768xbf16, #tpu.memory_space<vmem>>, %arg3: memref<1x768xf32, #tpu.memory_space<vmem>>, %arg4: memref<64x768xbf16, #tpu.memory_space<vmem>>) attributes {dimension_semantics = [#tpu.dimension_semantics<parallel>], iteration_bounds = array<i64: 1>, scalar_prefetch = 0 : i64, scratch_operands = 0 : i64, tpu.core_type = #tpu.core_type<tc>, window_params = [{transform_indices = @transform_0, window_bounds = array<i64: 64, 16>}, {pipeline_mode = #tpu.pipeline_mode<synchronous>, transform_indices = @transform_1, window_bounds = array<i64: 16, 768>}, {pipeline_mode = #tpu.pipeline_mode<synchronous>, transform_indices = @transform_2, window_bounds = array<i64: 1, 768>}, {transform_indices = @transform_3, window_bounds = array<i64: 64, 768>}]} {
    %c0 = arith.constant 0 : index
    %c0_0 = arith.constant 0 : index
    %0 = vector.load %arg1[%c0, %c0_0] : memref<64x16xbf16, #tpu.memory_space<vmem>>, vector<64x16xbf16>
    %c0_1 = arith.constant 0 : index
    %c0_2 = arith.constant 0 : index
    %1 = vector.load %arg2[%c0_1, %c0_2] : memref<16x768xbf16, #tpu.memory_space<vmem>>, vector<16x768xbf16>
    %cst = arith.constant dense<0.000000e+00> : vector<64x768xf32>
    %2 = tpu.matmul %0, %1, %cst {dimension_numbers = #tpu.dot_dimension_numbers<[1], [0], [0], [1], [0, 0, 1, 1], [], []>} : vector<64x16xbf16>, vector<16x768xbf16>, vector<64x768xf32> -> vector<64x768xf32>
    %c0_3 = arith.constant 0 : index
    %c0_4 = arith.constant 0 : index
    %3 = vector.load %arg3[%c0_3, %c0_4] : memref<1x768xf32, #tpu.memory_space<vmem>>, vector<1x768xf32>
    %4 = vector.broadcast %3 : vector<1x768xf32> to vector<64x768xf32>
    %5 = arith.addf %2, %4 : vector<64x768xf32>
    %6 = arith.truncf %5 : vector<64x768xf32> to vector<64x768xbf16>
    %c0_5 = arith.constant 0 : index
    %c0_6 = arith.constant 0 : index
    %7 = vector.load %arg4[%c0_5, %c0_6] : memref<64x768xbf16, #tpu.memory_space<vmem>>, vector<64x768xbf16>
    tpu.vector_store %arg4[%c0_5, %c0_6], %6 {strides = array<i32>} : memref<64x768xbf16, #tpu.memory_space<vmem>>, vector<64x768xbf16>,
    return
  }
  func.func @transform_0(%arg0: i32) -> (i32, i32) {
    %c0_i32 = arith.constant 0 : i32
    %c0_i32_0 = arith.constant 0 : i32
    return %arg0, %c0_i32 : i32, i32
  }
  func.func @transform_1(%arg0: i32) -> (i32, i32) {
    %c0_i32 = arith.constant 0 : i32
    %c0_i32_0 = arith.constant 0 : i32
    %c0_i32_1 = arith.constant 0 : i32
    return %c0_i32, %c0_i32_0 : i32, i32
  }
  func.func @transform_2(%arg0: i32) -> (i32, i32) {
    %c0_i32 = arith.constant 0 : i32
    %c0_i32_0 = arith.constant 0 : i32
    %c0_i32_1 = arith.constant 0 : i32
    return %c0_i32, %c0_i32_0 : i32, i32
  }
  func.func @transform_3(%arg0: i32) -> (i32, i32) {
    %c0_i32 = arith.constant 0 : i32
    %c0_i32_0 = arith.constant 0 : i32
    return %arg0, %c0_i32 : i32, i32
  }
}

</mosaic_0001>

<bundles_post_ra>
// kernel: tpu_custom_call.1
= control target key start
LH: loop header
LB: loop body
LE: loop exit
PB: predicated region body
PF: predicated region fallthrough
CT: control target
= control target key end

     0   :  { %8 = vsyncpa [#allocation3], 0  ;;  %s803_s0 = inlined_call_operand.vmem [shape: bf16[64,16], index: 0, kind: input, shape index: {}]   ;;  %s804_s1 = inlined_call_operand.hbm [shape: bf16[16,768], index: 1, kind: input, shape index: {}]   ;;  %s805_s2 = inlined_call_operand.vmem [shape: f32[1,768], index: 2, kind: input, shape index: {}]   ;;  %s806_s3 = inlined_call_operand.hbm [shape: bf16[64,768], index: 3, kind: output, shape index: {}]  }
   0x1   :  { %9 = vsyncpa [#allocation4], 0  ;;  %s681_s12 = smov [#allocation2]   ;;  %s633_s16 = scalar_lea.hbm %s804_s1, 768 }
   0x2   :  { %s17_s13 = sshll.u32 %s681_s12, 4  ;;  %p634_p0 = scmp.ne.s32.totalorder %s804_s1, %s633_s16  ;;  %s18_s13 = int_to_ptr.vmem [resolvable:$true] %s17_s13 }
   0x3   :  { %p637_p1 = scmp.lt.u32.totalorder %s633_s16, %s804_s1 }
   0x5   :  { %p639_p2 = pnand %p637_p1, %p634_p0 }
   0x7   :  { %642 = shalt.err (!%p639_p2)
}
   0x8   :  { %s643_s21 = scalar_lea.vmem %s18_s13, 768  ;;  %p648_p4 = scmp.lt.s32.totalorder %s18_s13, %s18_s13 }
   0x9   :  { %p644_p3 = scmp.ne.s32.totalorder %s18_s13, %s643_s21  ;;  %p649_p5 = scmp.lt.s32.totalorder %s643_s21, %s643_s21 }
   0xb   :  { %p650_p6 = por %p649_p5, %p648_p4 }
   0xd   :  { %p651_p7 = pnand %p650_p6, %p644_p3 }
   0xf   :  { %654 = shalt.err (!%p651_p7)
}
  0x10   :  { %s682_s22 = smov 384   ;;  %s683_s23 = smov 24  }
  0x11   :  { %23 = dma.hbm_to_vmem [thread:$0]  %s804_s1, 768, %s18_s13, [#allocation3], %s682_s22, %s682_s22, %s683_s23  }
  0x12   :  { %677 = dma.done.wait [#allocation3], 768  }
  0x13   :  { %678 = vsyncadd [#allocation3], 4294966528  ;;  %v684_v0 = vmov 0   ;;  %v620_v1 = vld [vmem:[#allocation2 + $0x4] ss:$24 sps:$4 sm:$0xff]   ;;  %vm126_vm0 = vcmask 130048   ;;  %v46_v11 = vlaneseq }
  0x14   :  { %171 = vmatprep.mubr.bf16.mxu0 %v684_v0  ;;  %191 = vmatprep.mubr.bf16.mxu1 %v684_v0  ;;  %v622_v2 = vld [vmem:[#allocation2] ss:$24 sps:$4 sm:$0xff]   ;;  %v624_v4 = vld [vmem:[%s803_s0 + $0x10] sm:$0xff]   ;;  %v627_v6 = vld [vmem:[#allocation2 + $0xc] ss:$24 sps:$4 sm:$0xff]  }
  0x15   :  { %139 = vmatprep.subr.bf16.mxu0 %v620_v1  ;;  %613 = vmatprep.subr.bf16.mxu1 %v620_v1  ;;  %v623_v3 = vld [vmem:[%s803_s0] sm:$0xff]   ;;  %v628_v7 = vld [vmem:[#allocation2 + $0x10] ss:$24 sps:$4 sm:$0xff]   ;;  %v630_v8 = vld [vmem:[#allocation2 + $0x14] ss:$24 sps:$4 sm:$0xff]   ;;  %v47_v12 = vshrl.u32 %v46_v11, 7 }
  0x16   :  { %140 = vmatpush1.bf16.msra.mxu0 %v622_v2  ;;  %614 = vmatpush1.bf16.msra.mxu1 %v622_v2  ;;  %v625_v5 = vld [vmem:[#allocation2 + $0x8] ss:$24 sps:$4 sm:$0xff]   ;;  %v632_v10 = vld [vmem:[%s803_s0 + $0x18] sm:$0xff]  }
  0x17   :  { %212 = vmatprep.subr.bf16.mxu1 %v627_v6  ;;  %285 = vmatprep.subr.bf16.mxu0 %v630_v8  ;;  %v631_v9 = vld [vmem:[%s803_s0 + $0x8] sm:$0xff]   ;;  %v48_v13 = vsub.s32 0, %v47_v12  ;;  %v44_v14 = vld [vmem:[%s805_s2] sm:$0x3f]  ;;  %v52_v15 = vsub.s32 1, %v47_v12  ;;  %v56_v44 = vsub.s32 2, %v47_v12 }
  0x18   :  { %v64_v45 = vsub.s32 4, %v47_v12  ;;  %v60_v50 = vsub.s32 3, %v47_v12  ;;  %v68_v51 = vsub.s32 5, %v47_v12  ;;  %s685_s2 = smov [#allocation5]  }
  0x19   :  { %553 = vmatmul.mubr.msk.bf16.vlgmr.msra.gmra.mrb[0].mxu0 %vm126_vm0, %v623_v3  ;;  %555 = vmatmul.mubr.msk.bf16.vlgmr.msra.gmra.mrb[0].mxu1 %vm126_vm0, %v624_v4  ;;  %v49_v16 = vrot.slane %v44_v14, %v48_v13  ;;  %v53_v17 = vrot.slane %v44_v14, %v52_v15  ;;  %v748_v60 = vrot.slane %v44_v14, %v56_v44  ;;  %s531_s7 = sshll.u32 %s685_s2, 4  ;;  %s532_s7 = int_to_ptr.vmem [resolvable:$true] %s531_s7 }
  0x1a   :  { %213 = vmatpush1.bf16.msra.mxu1 %v625_v5  ;;  %286 = vmatpush1.bf16.msra.mxu0 %v628_v7  ;;  %v750_v61 = vrot.slane %v44_v14, %v64_v45  ;;  %v754_v1 = vrot.slane %v44_v14, %v68_v51  ;;  %s655_s8 = scalar_lea.vmem %s532_s7, 3072  ;;  %p660_p9 = scmp.lt.s32.totalorder %s532_s7, %s532_s7 }
  0x1b   :  { %181 = vmatprep.mubr.bf16.mxu0 %v684_v0  ;;  %201 = vmatprep.mubr.bf16.mxu1 %v684_v0  ;;  %p656_p8 = scmp.ne.s32.totalorder %s532_s7, %s655_s8  ;;  %p661_p10 = scmp.lt.s32.totalorder %s655_s8, %s655_s8 }
  0x1d   :  { %p662_p11 = por %p661_p10, %p660_p9 }
  0x1f   :  { %p663_p12 = pnand %p662_p11, %p656_p8 }
  0x21   :  { %554 = vmatmul.mubr.msk.bf16.gmra.mrb[4].mxu0 %vm126_vm0, %v631_v9  ;;  %556 = vmatmul.mubr.msk.bf16.gmra.mrb[4].mxu1 %vm126_vm0, %v632_v10 }
  0x22   :  { %244 = vmatprep.mubr.bf16.mxu1 %v684_v0  ;;  %317 = vmatprep.mubr.bf16.mxu0 %v684_v0 }
  0x29   :  { %557 = vmatmul.mubr.msk.bf16.vlgmr.msra.gmra.mrb[8].mxu1 %vm126_vm0, %v623_v3  ;;  %561 = vmatmul.mubr.msk.bf16.vlgmr.msra.gmra.mrb[8].mxu0 %vm126_vm0, %v623_v3 }
  0x2a   :  { %254 = vmatprep.mubr.bf16.mxu1 %v684_v0  ;;  %327 = vmatprep.mubr.bf16.mxu0 %v684_v0 }
  0x31   :  { %558 = vmatmul.mubr.msk.bf16.gmra.mrb[12].mxu1 %vm126_vm0, %v631_v9  ;;  %562 = vmatmul.mubr.msk.bf16.gmra.mrb[12].mxu0 %vm126_vm0, %v631_v9 }
  0x32   :  { %264 = vmatprep.mubr.bf16.mxu1 %v684_v0  ;;  %337 = vmatprep.mubr.bf16.mxu0 %v684_v0 }
  0x39   :  { %559 = vmatmul.mubr.msk.bf16.gmra.mrb[16].mxu1 %vm126_vm0, %v624_v4  ;;  %563 = vmatmul.mubr.msk.bf16.gmra.mrb[16].mxu0 %vm126_vm0, %v624_v4 }
  0x3a   :  { %274 = vmatprep.mubr.bf16.mxu1 %v684_v0  ;;  %347 = vmatprep.mubr.bf16.mxu0 %v684_v0  ;;  %v752_v0 = vrot.slane %v44_v14, %v60_v50 }
  0x41   :  { %560 = vmatmul.mubr.msk.bf16.gmra.mrb[20].mxu1 %vm126_vm0, %v632_v10  ;;  %564 = vmatmul.mubr.msk.bf16.gmra.mrb[20].mxu0 %vm126_vm0, %v632_v10 }
  0xec   :  { %v173_v18 = vpop.f32.mrb[0].mxu0  ;;  %v193_v19 = vpop.f32.mrb[0].mxu1 }
  0xed   :  { %v174_v20 = vadd.f32 %v173_v18, %v49_v16  ;;  %v194_v21 = vadd.f32 %v193_v19, %v49_v16  ;;  %v175_v22 = vpop.f32.mrb[1].mxu0  ;;  %v195_v23 = vpop.f32.mrb[1].mxu1 }
  0xee   :  { %v176_v24 = vadd.f32 %v175_v22, %v53_v17  ;;  %v196_v25 = vadd.f32 %v195_v23, %v53_v17  ;;  %v177_v26 = vpop.f32.mrb[2].mxu0  ;;  %v197_v27 = vpop.f32.mrb[2].mxu1 }
  0xef   :  { %v178_v28 = vadd.f32 %v177_v26, %v49_v16  ;;  %v198_v29 = vadd.f32 %v197_v27, %v49_v16  ;;  %v179_v30 = vpop.f32.mrb[3].mxu0  ;;  %v199_v31 = vpop.f32.mrb[3].mxu1 }
  0xf0   :  { %v589_v32 = vpack.c.bf16 %v176_v24, %v174_v20  ;;  %v601_v33 = vpack.c.bf16 %v196_v25, %v194_v21  ;;  %v180_v34 = vadd.f32 %v179_v30, %v53_v17  ;;  %v200_v35 = vadd.f32 %v199_v31, %v53_v17 }
  0xf2   :  { %502 = vst [vmem:[#allocation5] sm:$0xff] %v589_v32  ;;  %514 = vst [vmem:[#allocation5 + $0x60] sm:$0xff] %v601_v33  ;;  %v592_v36 = vpack.c.bf16 %v180_v34, %v178_v28  ;;  %v604_v37 = vpack.c.bf16 %v200_v35, %v198_v29 }
  0xf4   :  { %505 = vst [vmem:[#allocation5 + $0x18] sm:$0xff] %v592_v36  ;;  %517 = vst [vmem:[#allocation5 + $0x78] sm:$0xff] %v604_v37  ;;  %v183_v38 = vpop.f32.mrb[4].mxu0  ;;  %v203_v39 = vpop.f32.mrb[4].mxu1 }
  0xf5   :  { %v184_v40 = vadd.f32 %v183_v38, %v49_v16  ;;  %v204_v41 = vadd.f32 %v203_v39, %v49_v16  ;;  %v185_v42 = vpop.f32.mrb[5].mxu0  ;;  %v205_v43 = vpop.f32.mrb[5].mxu1 }
  0xf6   :  { %v186_v46 = vadd.f32 %v185_v42, %v53_v17  ;;  %v206_v47 = vadd.f32 %v205_v43, %v53_v17  ;;  %v187_v48 = vpop.f32.mrb[6].mxu0  ;;  %v207_v49 = vpop.f32.mrb[6].mxu1 }
  0xf7   :  { %v188_v52 = vadd.f32 %v187_v48, %v49_v16  ;;  %v208_v53 = vadd.f32 %v207_v49, %v49_v16  ;;  %v189_v54 = vpop.f32.mrb[7].mxu0  ;;  %v209_v55 = vpop.f32.mrb[7].mxu1 }
  0xf8   :  { %v595_v56 = vpack.c.bf16 %v186_v46, %v184_v40  ;;  %v607_v57 = vpack.c.bf16 %v206_v47, %v204_v41  ;;  %v190_v58 = vadd.f32 %v189_v54, %v53_v17  ;;  %v210_v59 = vadd.f32 %v209_v55, %v53_v17 }
  0xfa   :  { %508 = vst [vmem:[#allocation5 + $0x30] sm:$0xff] %v595_v56  ;;  %520 = vst [vmem:[#allocation5 + $0x90] sm:$0xff] %v607_v57  ;;  %v598_v62 = vpack.c.bf16 %v190_v58, %v188_v52  ;;  %v610_v63 = vpack.c.bf16 %v210_v59, %v208_v53 }
  0xfc   :  { %511 = vst [vmem:[#allocation5 + $0x48] sm:$0xff] %v598_v62  ;;  %523 = vst [vmem:[#allocation5 + $0xa8] sm:$0xff] %v610_v63  ;;  %v246_v2 = vpop.f32.mrb[8].mxu1  ;;  %v319_v3 = vpop.f32.mrb[8].mxu0 }
  0xfd   :  { %v247_v4 = vadd.f32 %v246_v2, %v748_v60  ;;  %v320_v5 = vadd.f32 %v319_v3, %v750_v61  ;;  %v248_v6 = vpop.f32.mrb[9].mxu1  ;;  %v321_v7 = vpop.f32.mrb[9].mxu0 }
  0xfe   :  { %v249_v8 = vadd.f32 %v248_v6, %v752_v0  ;;  %v322_v9 = vadd.f32 %v321_v7, %v754_v1  ;;  %v250_v10 = vpop.f32.mrb[10].mxu1  ;;  %v323_v11 = vpop.f32.mrb[10].mxu0 }
  0xff   :  { %v251_v12 = vadd.f32 %v250_v10, %v748_v60  ;;  %v324_v13 = vadd.f32 %v323_v11, %v750_v61  ;;  %v252_v14 = vpop.f32.mrb[11].mxu1  ;;  %v325_v15 = vpop.f32.mrb[11].mxu0 }
 0x100   :  { %v590_v16 = vpack.c.bf16 %v249_v8, %v247_v4  ;;  %v591_v17 = vpack.c.bf16 %v322_v9, %v320_v5  ;;  %v253_v18 = vadd.f32 %v252_v14, %v752_v0  ;;  %v326_v19 = vadd.f32 %v325_v15, %v754_v1 }
 0x102   :  { %503 = vst [vmem:[#allocation5 + $0x8] sm:$0xff] %v590_v16  ;;  %504 = vst [vmem:[#allocation5 + $0x10] sm:$0xff] %v591_v17  ;;  %v593_v20 = vpack.c.bf16 %v253_v18, %v251_v12  ;;  %v594_v21 = vpack.c.bf16 %v326_v19, %v324_v13 }
 0x104   :  { %506 = vst [vmem:[#allocation5 + $0x20] sm:$0xff] %v593_v20  ;;  %507 = vst [vmem:[#allocation5 + $0x28] sm:$0xff] %v594_v21  ;;  %v256_v22 = vpop.f32.mrb[12].mxu1  ;;  %v329_v23 = vpop.f32.mrb[12].mxu0 }
 0x105   :  { %v257_v24 = vadd.f32 %v256_v22, %v748_v60  ;;  %v330_v25 = vadd.f32 %v329_v23, %v750_v61  ;;  %v258_v26 = vpop.f32.mrb[13].mxu1  ;;  %v331_v27 = vpop.f32.mrb[13].mxu0 }
 0x106   :  { %v259_v28 = vadd.f32 %v258_v26, %v752_v0  ;;  %v332_v29 = vadd.f32 %v331_v27, %v754_v1  ;;  %v260_v30 = vpop.f32.mrb[14].mxu1  ;;  %v333_v31 = vpop.f32.mrb[14].mxu0 }
 0x107   :  { %v261_v32 = vadd.f32 %v260_v30, %v748_v60  ;;  %v334_v33 = vadd.f32 %v333_v31, %v750_v61  ;;  %v262_v34 = vpop.f32.mrb[15].mxu1  ;;  %v335_v35 = vpop.f32.mrb[15].mxu0 }
 0x108   :  { %v596_v36 = vpack.c.bf16 %v259_v28, %v257_v24  ;;  %v597_v37 = vpack.c.bf16 %v332_v29, %v330_v25  ;;  %v263_v38 = vadd.f32 %v262_v34, %v752_v0  ;;  %v336_v39 = vadd.f32 %v335_v35, %v754_v1 }
 0x10a   :  { %509 = vst [vmem:[#allocation5 + $0x38] sm:$0xff] %v596_v36  ;;  %510 = vst [vmem:[#allocation5 + $0x40] sm:$0xff] %v597_v37  ;;  %v599_v40 = vpack.c.bf16 %v263_v38, %v261_v32  ;;  %v600_v41 = vpack.c.bf16 %v336_v39, %v334_v33 }
 0x10c   :  { %512 = vst [vmem:[#allocation5 + $0x50] sm:$0xff] %v599_v40  ;;  %513 = vst [vmem:[#allocation5 + $0x58] sm:$0xff] %v600_v41  ;;  %v266_v42 = vpop.f32.mrb[16].mxu1  ;;  %v339_v43 = vpop.f32.mrb[16].mxu0 }
 0x10d   :  { %v267_v44 = vadd.f32 %v266_v42, %v748_v60  ;;  %v340_v45 = vadd.f32 %v339_v43, %v750_v61  ;;  %v268_v46 = vpop.f32.mrb[17].mxu1  ;;  %v341_v47 = vpop.f32.mrb[17].mxu0 }
 0x10e   :  { %v269_v48 = vadd.f32 %v268_v46, %v752_v0  ;;  %v342_v49 = vadd.f32 %v341_v47, %v754_v1  ;;  %v270_v50 = vpop.f32.mrb[18].mxu1  ;;  %v343_v51 = vpop.f32.mrb[18].mxu0 }
 0x10f   :  { %v271_v52 = vadd.f32 %v270_v50, %v748_v60  ;;  %v344_v53 = vadd.f32 %v343_v51, %v750_v61  ;;  %v272_v54 = vpop.f32.mrb[19].mxu1  ;;  %v345_v55 = vpop.f32.mrb[19].mxu0 }
 0x110   :  { %v602_v56 = vpack.c.bf16 %v269_v48, %v267_v44  ;;  %v603_v57 = vpack.c.bf16 %v342_v49, %v340_v45  ;;  %v273_v58 = vadd.f32 %v272_v54, %v752_v0  ;;  %v346_v59 = vadd.f32 %v345_v55, %v754_v1 }
 0x112   :  { %515 = vst [vmem:[#allocation5 + $0x68] sm:$0xff] %v602_v56  ;;  %516 = vst [vmem:[#allocation5 + $0x70] sm:$0xff] %v603_v57  ;;  %v605_v62 = vpack.c.bf16 %v273_v58, %v271_v52  ;;  %v606_v63 = vpack.c.bf16 %v346_v59, %v344_v53 }
 0x114   :  { %518 = vst [vmem:[#allocation5 + $0x80] sm:$0xff] %v605_v62  ;;  %519 = vst [vmem:[#allocation5 + $0x88] sm:$0xff] %v606_v63  ;;  %v276_v2 = vpop.f32.mrb[20].mxu1  ;;  %v349_v3 = vpop.f32.mrb[20].mxu0 }
 0x115   :  { %v277_v4 = vadd.f32 %v276_v2, %v748_v60  ;;  %v350_v5 = vadd.f32 %v349_v3, %v750_v61  ;;  %v278_v6 = vpop.f32.mrb[21].mxu1  ;;  %v351_v7 = vpop.f32.mrb[21].mxu0 }
 0x116   :  { %v279_v8 = vadd.f32 %v278_v6, %v752_v0  ;;  %v352_v9 = vadd.f32 %v351_v7, %v754_v1  ;;  %v280_v10 = vpop.f32.mrb[22].mxu1  ;;  %v353_v11 = vpop.f32.mrb[22].mxu0 }
 0x117   :  { %v281_v12 = vadd.f32 %v280_v10, %v748_v60  ;;  %v354_v13 = vadd.f32 %v353_v11, %v750_v61  ;;  %v282_v14 = vpop.f32.mrb[23].mxu1  ;;  %v355_v15 = vpop.f32.mrb[23].mxu0 }
 0x118   :  { %v608_v16 = vpack.c.bf16 %v279_v8, %v277_v4  ;;  %v609_v17 = vpack.c.bf16 %v352_v9, %v350_v5  ;;  %v283_v18 = vadd.f32 %v282_v14, %v752_v0  ;;  %v356_v19 = vadd.f32 %v355_v15, %v754_v1 }
 0x11a   :  { %521 = vst [vmem:[#allocation5 + $0x98] sm:$0xff] %v608_v16  ;;  %522 = vst [vmem:[#allocation5 + $0xa0] sm:$0xff] %v609_v17  ;;  %v611_v20 = vpack.c.bf16 %v283_v18, %v281_v12  ;;  %v612_v21 = vpack.c.bf16 %v356_v19, %v354_v13 }
 0x11c   :  { %524 = vst [vmem:[#allocation5 + $0xb0] sm:$0xff] %v611_v20  ;;  %525 = vst [vmem:[#allocation5 + $0xb8] sm:$0xff] %v612_v21 }
 0x11d   :  { %666 = shalt.err (!%p663_p12)
}
 0x11e   :  { %s667_s11 = scalar_lea.hbm %s806_s3, 3072 }
 0x11f   :  { %p668_p13 = scmp.ne.s32.totalorder %s806_s3, %s667_s11  ;;  %p671_p0 = scmp.lt.u32.totalorder %s667_s11, %s806_s3 }
 0x121   :  { %p673_p1 = pnand %p671_p0, %p668_p13 }
 0x123   :  { %676 = shalt.err (!%p673_p1)
}
 0x124   :  { %537 = dma.vmem_to_hbm [thread:$0]  %s532_s7, 3072, %s806_s3, [#allocation4], %s682_s22, %s682_s22, %s683_s23  }
 0x125   :  { %679 = dma.done.wait [#allocation4], 3072  }
 0x126   :  { %680 = vsyncadd [#allocation4], 4294964224 }
 0x127   :  { %541 = vsyncpa [#allocation3], 1 }
 0x128   :  { %542 = vsyncpa [#allocation4], 1 }

</bundles_post_ra>
